<compile_context>
chip_gen: v5e
topology: v5e:2x2
jax: 0.10.0
libtpu: 0.0.40
codegen_flags: <defaults>
</compile_context>

<pallas_src>
import jax
import jax.numpy as jnp
from jax.experimental import pallas as pl
from jax.experimental.pallas import tpu as pltpu


def _volume_render_kernel(feat_ref, depth_ref, dnorm_ref, rgb_out_ref, w_out_ref):
    depth = depth_ref[...]                       # (S, TN) f32
    sigma = feat_ref[3]                          # (S, TN) f32
    dnorm = dnorm_ref[...]                       # (1, TN) f32
    s = depth.shape[0]

    row = jax.lax.broadcasted_iota(jnp.int32, depth.shape, 0)   # sublane index

    # gamma_i = depth_{i+1} - depth_i, huge "far" distance for the last sample.
    # pltpu.roll (XLU slot) + where (VPU): no sublane slice/concat relayouts.
    nxt = pltpu.roll(depth, s - 1, 0)            # row i <- depth[(i + 1) % s]
    gammas = jnp.where(row == s - 1, jnp.float32(1.0e10), nxt - depth)
    gammas = gammas * dnorm                      # broadcast over S

    alpha = 1.0 - jnp.exp(-sigma * gammas)       # (S, TN)
    t_in = 1.0 - alpha + 1e-10

    # Exclusive cumulative product along S via an O(log S) Hillis-Steele scan on
    # full lane-dense tiles (roll + masked multiply), then shift down one row.
    prod = t_in
    offset = 1
    while offset < s:
        shifted = pltpu.roll(prod, offset, 0)    # row i <- prod[(i - offset) % s]
        prod = prod * jnp.where(row >= offset, shifted, jnp.float32(1.0))
        offset *= 2
    # prod[i] = prod_{j <= i} t_in[j]; exclusive: T[i] = prod[i-1], T[0] = 1.
    big_t = jnp.where(row >= 1, pltpu.roll(prod, 1, 0), jnp.float32(1.0))

    weights = big_t * alpha                      # (S, TN)
    w_out_ref[...] = weights                     # lane-dense full-tile store

    # C(r)[c] = sum_i weights_i * rgb_i[c]: per-channel multiply + sublane
    # reduction, written straight into the output rows (no concatenate).
    for c in range(3):
        rgb_out_ref[c:c + 1, :] = jnp.sum(feat_ref[c] * weights, axis=0,
                                          keepdims=True)


def volume_render(radiance_field, ray_directions, ray_depth_samples,
                  include_weights=True, block_rays=8192):
    """radiance_field: (B, R, S, 4), ray_directions: (B, R, 3), depth: (B, R, S)."""
    b, r, s, c = radiance_field.shape
    assert c == 4
    n = b * r

    # ---- wrapper-side layout plumbing: one HBM pass per operand, rays -> lanes ----
    feat = jnp.transpose(radiance_field.reshape(n, s, 4).astype(jnp.float32),
                         (2, 1, 0))                                    # (4, S, N)
    depth = jnp.transpose(ray_depth_samples.reshape(n, s).astype(jnp.float32),
                          (1, 0))                                      # (S, N)
    dirs = ray_directions.reshape(n, 3).astype(jnp.float32)
    dnorm = jnp.sqrt(jnp.sum(dirs * dirs, axis=-1))[None, :]           # (1, N)

    # ---- block sizing: biggest lane-dense ray block whose pipelined working set
    # fits this chip's VMEM (v5e/v6e: 128 MiB, v7x: 64 MiB). ----
    LANE = 128
    try:
        vmem_cap = int(pltpu.get_tpu_info().vmem_capacity_bytes)
    except Exception:
        vmem_cap = 64 * 1024 * 1024               # v7x-conservative fallback
    vmem_limit = min(vmem_cap // 2, 100 * 1024 * 1024)
    budget = (vmem_limit * 3) // 4
    # per-lane bytes: double-buffered inputs+outputs plus ~6 full-tile f32 temps
    per_lane = (2 * (6 * s + 4) + 6 * s) * 4
    tn = min(block_rays, max(LANE, (budget // per_lane) // LANE * LANE))
    tn = max(LANE, (tn // LANE) * LANE)
    if n <= tn:
        if n >= 2 * LANE:
            # >= 2 "parallel" grid steps so both v7x TensorCores get work.
            tn = (((n + 1) // 2) + LANE - 1) // LANE * LANE
        else:
            tn = n                                # one exact block (full-dim lanes)
    grid = (pl.cdiv(n, tn),)                      # ragged last block: OOB masked

    out_rgb_t, weights_t = pl.pallas_call(
        _volume_render_kernel,
        out_shape=(jax.ShapeDtypeStruct((3, n), jnp.float32),
                   jax.ShapeDtypeStruct((s, n), jnp.float32)),
        grid=grid,
        in_specs=[
            pl.BlockSpec((4, s, tn), lambda i: (0, 0, i)),
            pl.BlockSpec((s, tn), lambda i: (0, i)),
            pl.BlockSpec((1, tn), lambda i: (0, i)),
        ],
        out_specs=(
            pl.BlockSpec((3, tn), lambda i: (0, i)),
            pl.BlockSpec((s, tn), lambda i: (0, i)),
        ),
        compiler_params=pltpu.CompilerParams(
            dimension_semantics=("parallel",),
            vmem_limit_bytes=vmem_limit,
        ),
    )(feat, depth, dnorm)

    # Transpose back to torch-shaped outputs.  (Consumers that accept the
    # lane-major (3, N) / (S, N) layouts should skip this extra HBM pass.)
    out_rgb = jnp.transpose(out_rgb_t, (1, 0)).reshape(b, r, 3)
    weights = jnp.transpose(weights_t, (1, 0)).reshape(b, r, s)
    if include_weights:
        return [out_rgb, weights]
    return out_rgb


def volume_render_ref(radiance_field, ray_directions, ray_depth_samples):
    """Pure-JAX reference mirroring the torch forward (incl. cumprod_exclusive)."""
    gammas = jnp.concatenate(
        [ray_depth_samples[..., 1:] - ray_depth_samples[..., :-1],
         jnp.broadcast_to(jnp.float32(1.0e10), ray_depth_samples[..., :1].shape)],
        axis=-1)
    gammas = gammas * jnp.linalg.norm(ray_directions[..., None, :], axis=-1)
    rgb = radiance_field[..., :3]
    sigmas = radiance_field[..., 3]
    alpha = 1.0 - jnp.exp(-sigmas * gammas)
    x = 1.0 - alpha + 1e-10
    cp = jnp.cumprod(x, axis=-1)
    cp = jnp.roll(cp, 1, axis=-1)
    cp = cp.at[..., 0].set(1.0)
    weights = cp * alpha
    out_rgb = jnp.sum(weights[..., None] * rgb, axis=-2)
    return out_rgb, weights


if __name__ == "__main__":
    key = jax.random.PRNGKey(0)
    k1, k2, k3 = jax.random.split(key, 3)
    B, R, S = 2, 64, 8

    # sigma >= 0 (as produced by a NeRF MLP after activation) keeps exp() well-behaved.
    radiance_field = jax.random.uniform(k1, (B, R, S, 4), dtype=jnp.float32)
    ray_directions = jax.random.normal(k2, (B, R, 3), dtype=jnp.float32)
    base = jnp.linspace(2.0, 6.0, S, dtype=jnp.float32)
    jitter = jax.random.uniform(k3, (B, R, S), dtype=jnp.float32, minval=0.0, maxval=0.2)
    ray_depth_samples = base[None, None, :] + jitter

    out_rgb, weights = volume_render(
        radiance_field, ray_directions, ray_depth_samples, include_weights=True)
    jax.block_until_ready((out_rgb, weights))

    ref_rgb, ref_w = volume_render_ref(radiance_field, ray_directions, ray_depth_samples)
    assert out_rgb.shape == (B, R, 3) and weights.shape == (B, R, S)
    assert jnp.allclose(out_rgb, ref_rgb, atol=1e-5, rtol=1e-5)
    assert jnp.allclose(weights, ref_w, atol=1e-5, rtol=1e-5)
    print("KERNEL_OK")
</pallas_src>

<mosaic_0001>
module attributes {stable_mosaic.version = 11 : i64} {
  func.func @_volume_render_kernel(%arg0: i32, %arg1: memref<4x8x128xf32, #tpu.memory_space<vmem>>, %arg2: memref<8x128xf32, #tpu.memory_space<vmem>>, %arg3: memref<1x128xf32, #tpu.memory_space<vmem>>, %arg4: memref<3x128xf32, #tpu.memory_space<vmem>>, %arg5: memref<8x128xf32, #tpu.memory_space<vmem>>) attributes {dimension_semantics = [#tpu.dimension_semantics<parallel>], iteration_bounds = array<i64: 1>, scalar_prefetch = 0 : i64, scratch_operands = 0 : i64, tpu.core_type = #tpu.core_type<tc>, window_params = [{transform_indices = @transform_0, window_bounds = array<i64: 4, 8, 128>}, {transform_indices = @transform_1, window_bounds = array<i64: 8, 128>}, {transform_indices = @transform_2, window_bounds = array<i64: 1, 128>}, {transform_indices = @transform_3, window_bounds = array<i64: 3, 128>}, {transform_indices = @transform_4, window_bounds = array<i64: 8, 128>}]} {
    %c0 = arith.constant 0 : index
    %c0_0 = arith.constant 0 : index
    %0 = vector.load %arg2[%c0, %c0_0] : memref<8x128xf32, #tpu.memory_space<vmem>>, vector<8x128xf32>
    %c3 = arith.constant 3 : index
    %c0_1 = arith.constant 0 : index
    %c0_2 = arith.constant 0 : index
    %1 = vector.load %arg1[%c3, %c0_1, %c0_2] : memref<4x8x128xf32, #tpu.memory_space<vmem>>, vector<1x8x128xf32>
    %2 = vector.shape_cast %1 : vector<1x8x128xf32> to vector<8x128xf32>
    %c0_3 = arith.constant 0 : index
    %c0_4 = arith.constant 0 : index
    %3 = vector.load %arg3[%c0_3, %c0_4] : memref<1x128xf32, #tpu.memory_space<vmem>>, vector<1x128xf32>
    %4 = tpu.iota {dimensions = array<i32: 0>} : vector<8x128xi32>
    %c7_i32 = arith.constant 7 : i32
    %5 = tpu.dynamic_rotate %0 by %c7_i32 dim 0 : vector<8x128xf32>, i32 -> vector<8x128xf32>
    %c7_i32_5 = arith.constant 7 : i32
    %6 = vector.broadcast %c7_i32_5 : i32 to vector<8x128xi32>
    %7 = arith.cmpi eq, %4, %6 : vector<8x128xi32>
    %8 = arith.subf %5, %0 : vector<8x128xf32>
    %cst = arith.constant 1.000000e+10 : f32
    %9 = vector.broadcast %cst : f32 to vector<8x128xf32>
    %10 = arith.select %7, %9, %8 : vector<8x128xi1>, vector<8x128xf32>
    %11 = vector.broadcast %3 : vector<1x128xf32> to vector<8x128xf32>
    %12 = arith.mulf %10, %11 : vector<8x128xf32>
    %cst_6 = arith.constant 0.000000e+00 : f32
    %13 = vector.broadcast %cst_6 : f32 to vector<8x128xf32>
    %14 = arith.subf %13, %2 : vector<8x128xf32>
    %15 = arith.mulf %14, %12 : vector<8x128xf32>
    %16 = math.exp %15 : vector<8x128xf32>
    %cst_7 = arith.constant 1.000000e+00 : f32
    %17 = vector.broadcast %cst_7 : f32 to vector<8x128xf32>
    %18 = arith.subf %17, %16 : vector<8x128xf32>
    %cst_8 = arith.constant 1.000000e+00 : f32
    %19 = vector.broadcast %cst_8 : f32 to vector<8x128xf32>
    %20 = arith.subf %19, %18 : vector<8x128xf32>
    %cst_9 = arith.constant 1.000000e-10 : f32
    %21 = vector.broadcast %cst_9 : f32 to vector<8x128xf32>
    %22 = arith.addf %20, %21 : vector<8x128xf32>
    %c1_i32 = arith.constant 1 : i32
    %23 = tpu.dynamic_rotate %22 by %c1_i32 dim 0 : vector<8x128xf32>, i32 -> vector<8x128xf32>
    %c1_i32_10 = arith.constant 1 : i32
    %24 = vector.broadcast %c1_i32_10 : i32 to vector<8x128xi32>
    %25 = arith.cmpi sge, %4, %24 : vector<8x128xi32>
    %cst_11 = arith.constant 1.000000e+00 : f32
    %26 = vector.broadcast %cst_11 : f32 to vector<8x128xf32>
    %27 = arith.select %25, %23, %26 : vector<8x128xi1>, vector<8x128xf32>
    %28 = arith.mulf %22, %27 : vector<8x128xf32>
    %c2_i32 = arith.constant 2 : i32
    %29 = tpu.dynamic_rotate %28 by %c2_i32 dim 0 : vector<8x128xf32>, i32 -> vector<8x128xf32>
    %c2_i32_12 = arith.constant 2 : i32
    %30 = vector.broadcast %c2_i32_12 : i32 to vector<8x128xi32>
    %31 = arith.cmpi sge, %4, %30 : vector<8x128xi32>
    %cst_13 = arith.constant 1.000000e+00 : f32
    %32 = vector.broadcast %cst_13 : f32 to vector<8x128xf32>
    %33 = arith.select %31, %29, %32 : vector<8x128xi1>, vector<8x128xf32>
    %34 = arith.mulf %28, %33 : vector<8x128xf32>
    %c4_i32 = arith.constant 4 : i32
    %35 = tpu.dynamic_rotate %34 by %c4_i32 dim 0 : vector<8x128xf32>, i32 -> vector<8x128xf32>
    %c4_i32_14 = arith.constant 4 : i32
    %36 = vector.broadcast %c4_i32_14 : i32 to vector<8x128xi32>
    %37 = arith.cmpi sge, %4, %36 : vector<8x128xi32>
    %cst_15 = arith.constant 1.000000e+00 : f32
    %38 = vector.broadcast %cst_15 : f32 to vector<8x128xf32>
    %39 = arith.select %37, %35, %38 : vector<8x128xi1>, vector<8x128xf32>
    %40 = arith.mulf %34, %39 : vector<8x128xf32>
    %c1_i32_16 = arith.constant 1 : i32
    %41 = vector.broadcast %c1_i32_16 : i32 to vector<8x128xi32>
    %42 = arith.cmpi sge, %4, %41 : vector<8x128xi32>
    %c1_i32_17 = arith.constant 1 : i32
    %43 = tpu.dynamic_rotate %40 by %c1_i32_17 dim 0 : vector<8x128xf32>, i32 -> vector<8x128xf32>
    %cst_18 = arith.constant 1.000000e+00 : f32
    %44 = vector.broadcast %cst_18 : f32 to vector<8x128xf32>
    %45 = arith.select %42, %43, %44 : vector<8x128xi1>, vector<8x128xf32>
    %46 = arith.mulf %45, %18 : vector<8x128xf32>
    %c0_19 = arith.constant 0 : index
    %c0_20 = arith.constant 0 : index
    %47 = vector.load %arg5[%c0_19, %c0_20] : memref<8x128xf32, #tpu.memory_space<vmem>>, vector<8x128xf32>
    tpu.vector_store %arg5[%c0_19, %c0_20], %46 {strides = array<i32>} : memref<8x128xf32, #tpu.memory_space<vmem>>, vector<8x128xf32>,
    %c0_21 = arith.constant 0 : index
    %c0_22 = arith.constant 0 : index
    %c0_23 = arith.constant 0 : index
    %48 = vector.load %arg1[%c0_21, %c0_22, %c0_23] : memref<4x8x128xf32, #tpu.memory_space<vmem>>, vector<1x8x128xf32>
    %49 = vector.shape_cast %48 : vector<1x8x128xf32> to vector<8x128xf32>
    %50 = arith.mulf %49, %46 : vector<8x128xf32>
    %cst_24 = arith.constant dense<0.000000e+00> : vector<128xf32>
    %51 = vector.multi_reduction <add>, %50, %cst_24 [0] : vector<8x128xf32> to vector<128xf32>
    %52 = vector.shape_cast %51 : vector<128xf32> to vector<1x128xf32>
    %c0_25 = arith.constant 0 : index
    %c0_26 = arith.constant 0 : index
    %53 = vector.load %arg4[%c0_25, %c0_26] : memref<3x128xf32, #tpu.memory_space<vmem>>, vector<1x128xf32>
    tpu.vector_store %arg4[%c0_25, %c0_26], %52 {strides = array<i32>} : memref<3x128xf32, #tpu.memory_space<vmem>>, vector<1x128xf32>,
    %c1 = arith.constant 1 : index
    %c0_27 = arith.constant 0 : index
    %c0_28 = arith.constant 0 : index
    %54 = vector.load %arg1[%c1, %c0_27, %c0_28] : memref<4x8x128xf32, #tpu.memory_space<vmem>>, vector<1x8x128xf32>
    %55 = vector.shape_cast %54 : vector<1x8x128xf32> to vector<8x128xf32>
    %56 = arith.mulf %55, %46 : vector<8x128xf32>
    %cst_29 = arith.constant dense<0.000000e+00> : vector<128xf32>
    %57 = vector.multi_reduction <add>, %56, %cst_29 [0] : vector<8x128xf32> to vector<128xf32>
    %58 = vector.shape_cast %57 : vector<128xf32> to vector<1x128xf32>
    %c1_30 = arith.constant 1 : index
    %c0_31 = arith.constant 0 : index
    %59 = vector.load %arg4[%c1_30, %c0_31] : memref<3x128xf32, #tpu.memory_space<vmem>>, vector<1x128xf32>
    tpu.vector_store %arg4[%c1_30, %c0_31], %58 {strides = array<i32>} : memref<3x128xf32, #tpu.memory_space<vmem>>, vector<1x128xf32>,
    %c2 = arith.constant 2 : index
    %c0_32 = arith.constant 0 : index
    %c0_33 = arith.constant 0 : index
    %60 = vector.load %arg1[%c2, %c0_32, %c0_33] : memref<4x8x128xf32, #tpu.memory_space<vmem>>, vector<1x8x128xf32>
    %61 = vector.shape_cast %60 : vector<1x8x128xf32> to vector<8x128xf32>
    %62 = arith.mulf %61, %46 : vector<8x128xf32>
    %cst_34 = arith.constant dense<0.000000e+00> : vector<128xf32>
    %63 = vector.multi_reduction <add>, %62, %cst_34 [0] : vector<8x128xf32> to vector<128xf32>
    %64 = vector.shape_cast %63 : vector<128xf32> to vector<1x128xf32>
    %c2_35 = arith.constant 2 : index
    %c0_36 = arith.constant 0 : index
    %65 = vector.load %arg4[%c2_35, %c0_36] : memref<3x128xf32, #tpu.memory_space<vmem>>, vector<1x128xf32>
    tpu.vector_store %arg4[%c2_35, %c0_36], %64 {strides = array<i32>} : memref<3x128xf32, #tpu.memory_space<vmem>>, vector<1x128xf32>,
    return
  }
  func.func @transform_0(%arg0: i32) -> (i32, i32, i32) {
    %c0_i32 = arith.constant 0 : i32
    %c0_i32_0 = arith.constant 0 : i32
    %c0_i32_1 = arith.constant 0 : i32
    return %c0_i32, %c0_i32_0, %arg0 : i32, i32, i32
  }
  func.func @transform_1(%arg0: i32) -> (i32, i32) {
    %c0_i32 = arith.constant 0 : i32
    %c0_i32_0 = arith.constant 0 : i32
    return %c0_i32, %arg0 : i32, i32
  }
  func.func @transform_2(%arg0: i32) -> (i32, i32) {
    %c0_i32 = arith.constant 0 : i32
    %c0_i32_0 = arith.constant 0 : i32
    return %c0_i32, %arg0 : i32, i32
  }
  func.func @transform_3(%arg0: i32) -> (i32, i32) {
    %c0_i32 = arith.constant 0 : i32
    %c0_i32_0 = arith.constant 0 : i32
    return %c0_i32, %arg0 : i32, i32
  }
  func.func @transform_4(%arg0: i32) -> (i32, i32) {
    %c0_i32 = arith.constant 0 : i32
    %c0_i32_0 = arith.constant 0 : i32
    return %c0_i32, %arg0 : i32, i32
  }
}

</mosaic_0001>

<bundles_post_ra>
// kernel: tpu_custom_call.1
= control target key start
LH: loop header
LB: loop body
LE: loop exit
PB: predicated region body
PF: predicated region fallthrough
CT: control target
= control target key end

     0   :  { %10 = vsyncpa [#allocation3], 0  ;;  %s309_s0 = inlined_call_operand.hbm [shape: f32[4,8,128], index: 0, kind: input, shape index: {}]   ;;  %s310_s1 = inlined_call_operand.hbm [shape: f32[8,128], index: 1, kind: input, shape index: {}]   ;;  %s311_s2 = inlined_call_operand.vmem [shape: f32[1,128], index: 2, kind: input, shape index: {}]   ;;  %s312_s3 = inlined_call_operand.hbm [shape: f32[3,128], index: 3, kind: output, shape index: {0}]   ;;  %s313_s4 = inlined_call_operand.hbm [shape: f32[8,128], index: 4, kind: output, shape index: {1}]  }
   0x1   :  { %11 = vsyncpa [#allocation6], 0 }
   0x2   :  { %12 = vsyncpa [#allocation4], 0 }
   0x3   :  { %13 = vsyncpa [#allocation9], 0  ;;  %s18_s17 = sshll.u32 %s309_s0, 4  ;;  %s261_s18 = smov [#allocation2]   ;;  %s19_s17 = int_to_ptr.hbm [resolvable:$true] %s18_s17 }
   0x4   :  { %s20_s19 = sshll.u32 %s261_s18, 4  ;;  %s32_s22 = sshll.u32 %s310_s1, 4  ;;  %s21_s19 = int_to_ptr.vmem [resolvable:$true] %s20_s19  ;;  %s33_s22 = int_to_ptr.hbm [resolvable:$true] %s32_s22 }
   0x5   :  { %s262_s23 = smov 128   ;;  %s263_s24 = smov 8  }
   0x6   :  { %26 = dma.hbm_to_vmem [thread:$0]  %s19_s17, 512, %s21_s19, [#allocation3], %s262_s23, %s262_s23, %s263_s24  }
   0x7   :  { %s264_s25 = smov [#allocation5]  }
   0x8   :  { %s34_s26 = sshll.u32 %s264_s25, 4  ;;  %s35_s26 = int_to_ptr.vmem [resolvable:$true] %s34_s26 }
   0x9   :  { %37 = dma.hbm_to_vmem [thread:$0]  %s33_s22, 128, %s35_s26, [#allocation6]  }
   0xa   :  { %253 = dma.done.wait [#allocation3], 512  }
   0xb   :  { %254 = vsyncadd [#allocation3], 4294966784 }
   0xc   :  { %255 = dma.done.wait [#allocation6], 128  }
   0xd   :  { %256 = vsyncadd [#allocation6], 4294967168  ;;  %v52_v0 = vlaneseq  ;;  %v48_v2 = vld [vmem:[#allocation5] sm:$0xff]  ;;  %v50_v3 = vld [vmem:[#allocation2 + $0x18] sm:$0xff]  ;;  %s132_s30 = sshll.u32 %s313_s4, 4  ;;  %s266_s4 = smov [#allocation7]   ;;  %s133_s30 = int_to_ptr.hbm [resolvable:$true] %s132_s30 }
   0xe   :  { %v54_v4 = vrot.slane %v48_v2, 1  ;;  %v154_v5 = vld [vmem:[%s311_s2] ss:$0 sm:$0xff]  ;;  %v62_v7 = vsub.f32 0.0, %v50_v3  ;;  %s265_s2 = smov [#allocation8]   ;;  %v95_v28 = vld [vmem:[#allocation2 + $0x8] sm:$0xff] }
   0xf   :  { %v53_v1 = vshrl.u32 %v52_v0, 7  ;;  %s130_s27 = sshll.u32 %s265_s2, 4  ;;  %v85_v27 = vld [vmem:[#allocation2] sm:$0xff]  ;;  %v105_v29 = vld [vmem:[#allocation2 + $0x10] sm:$0xff]  ;;  %s119_s5 = sshll.u32 %s266_s4, 4  ;;  %s131_s27 = int_to_ptr.vmem [resolvable:$true] %s130_s27  ;;  %s120_s5 = int_to_ptr.vmem [resolvable:$true] %s119_s5 }
  0x10   :  { %v56_v6 = vsub.f32 %v54_v4, %v48_v2  ;;  %s121_s8 = sshll.u32 %s312_s3, 4  ;;  %s122_s8 = int_to_ptr.hbm [resolvable:$true] %s121_s8 }
  0x11   :  { %vm55_vm0 = vcmp.eq.s32.totalorder %v53_v1, 7  ;;  %vm70_vm1 = vcmp.ge.s32.totalorder %v53_v1, 1  ;;  %vm74_vm2 = vcmp.ge.s32.totalorder %v53_v1, 2  ;;  %vm78_vm3 = vcmp.ge.s32.totalorder %v53_v1, 4 }
  0x12   :  { %v57_v8 = vsel %vm55_vm0, 1e+10, %v56_v6 }
  0x13   :  { %v61_v9 = vmul.f32 %v154_v5, %v57_v8 }
  0x15   :  { %v63_v10 = vmul.f32 %v62_v7, %v61_v9 }
  0x17   :  { %v64_v11 = vmul.f32 1.442695, %v63_v10 }
  0x19   :  { %155 = vpow2.f32 %v64_v11 }
  0x1f   :  { %v156_v12 = vpop.eup %155 }
  0x20   :  { %v66_v13 = vsub.f32 1.0, %v156_v12 }
  0x22   :  { %v67_v14 = vsub.f32 1.0, %v66_v13 }
  0x24   :  { %v68_v15 = vadd.f32 1e-10, %v67_v14 }
  0x26   :  { %v69_v16 = vrot.slane %v68_v15, 7 }
  0x28   :  { %v71_v17 = vsel %vm70_vm1, %v69_v16, 1.0 }
  0x29   :  { %v72_v18 = vmul.f32 %v71_v17, %v68_v15 }
  0x2b   :  { %v73_v19 = vrot.slane %v72_v18, 6 }
  0x2d   :  { %v75_v20 = vsel %vm74_vm2, %v73_v19, 1.0 }
  0x2e   :  { %v76_v21 = vmul.f32 %v75_v20, %v72_v18 }
  0x30   :  { %v77_v22 = vrot.slane %v76_v21, 4 }
  0x32   :  { %v79_v23 = vsel %vm78_vm3, %v77_v22, 1.0 }
  0x33   :  { %v80_v24 = vmul.f32 %v79_v23, %v76_v21 }
  0x35   :  { %v81_v25 = vrot.slane %v80_v24, 7 }
  0x37   :  { %v82_v26 = vsel %vm70_vm1, %v81_v25, 1.0 }
  0x38   :  { %v83_v30 = vmul.f32 %v82_v26, %v66_v13 }
  0x3a   :  { %84 = vst [vmem:[#allocation8] sm:$0xff] %v83_v30  ;;  %v86_v31 = vmul.f32 %v85_v27, %v83_v30  ;;  %v96_v32 = vmul.f32 %v95_v28, %v83_v30  ;;  %v106_v33 = vmul.f32 %v105_v29, %v83_v30 }
  0x3b   :  { %135 = dma.vmem_to_hbm [thread:$0]  %s131_s27, 128, %s133_s30, [#allocation9]  }
  0x3c   :  { %v87_v34 = vrot.slane %v86_v31, 4  ;;  %v97_v35 = vrot.slane %v96_v32, 4  ;;  %v107_v36 = vrot.slane %v106_v33, 4 }
  0x3e   :  { %v88_v37 = vadd.f32 %v87_v34, %v86_v31  ;;  %v98_v38 = vadd.f32 %v97_v35, %v96_v32  ;;  %v108_v39 = vadd.f32 %v107_v36, %v106_v33 }
  0x40   :  { %v89_v40 = vrot.slane %v88_v37, 2  ;;  %v99_v41 = vrot.slane %v98_v38, 2  ;;  %v109_v42 = vrot.slane %v108_v39, 2 }
  0x42   :  { %v90_v43 = vadd.f32 %v89_v40, %v88_v37  ;;  %v100_v44 = vadd.f32 %v99_v41, %v98_v38  ;;  %v110_v45 = vadd.f32 %v109_v42, %v108_v39 }
  0x44   :  { %v91_v46 = vrot.slane %v90_v43, 1  ;;  %v101_v47 = vrot.slane %v100_v44, 1  ;;  %v111_v48 = vrot.slane %v110_v45, 1 }
  0x46   :  { %v92_v49 = vadd.f32 %v91_v46, %v90_v43  ;;  %v102_v50 = vadd.f32 %v101_v47, %v100_v44  ;;  %v112_v51 = vadd.f32 %v111_v48, %v110_v45 }
  0x48   :  { %93 = vst [vmem:[#allocation7] sm:$0x1] %v92_v49 }
  0x49   :  { %103 = vst [vmem:[#allocation7 + $0x1] sm:$0x1] %v102_v50 }
  0x4a   :  { %113 = vst [vmem:[#allocation7 + $0x2] sm:$0x1] %v112_v51 }
  0x4b   :  { %124 = dma.vmem_to_hbm [thread:$0]  %s120_s5, 64, %s122_s8, [#allocation4]  }
  0x4c   :  { %257 = dma.done.wait [#allocation4], 64  }
  0x4d   :  { %258 = vsyncadd [#allocation4], 4294967232 }
  0x4e   :  { %259 = dma.done.wait [#allocation9], 128  }
  0x4f   :  { %260 = vsyncadd [#allocation9], 4294967168 }
  0x50   :  { %144 = vsyncpa [#allocation3], 1 }
  0x51   :  { %145 = vsyncpa [#allocation6], 1 }
  0x52   :  { %146 = vsyncpa [#allocation4], 1 }
  0x53   :  { %147 = vsyncpa [#allocation9], 1 }

</bundles_post_ra>
